<compile_context>
chip_gen: v6e
topology: v6e:2x2x1
jax: 0.10.0
libtpu: 0.0.40
codegen_flags: <defaults>
</compile_context>

<pallas_src>
import jax
import jax.numpy as jnp
from jax.experimental import pallas as pl
from jax.experimental.pallas import tpu as pltpu

EPS = 1e-5
OUT_DIM = 28 * 28          # 784
OUT_PAD = 7 * 128          # 896: lane-dense (multiple of 128) output slab


def decoder_kernel(bn_ref,                    # SMEM (6,): [g0, b0, g1, b1, g2, b2]
                   z_ref,                     # (1, B, D)       f32
                   w1_ref, s1_ref, b1_ref,    # (D, 53) bf16, colsum (1,53) f32, bias (1,53) f32
                   w2_ref, s2_ref, b2_ref,    # (53, 23) bf16, (1,23) f32, (1,23) f32
                   wf_ref, sf_ref, bf_ref,    # (23, OUT_PAD) bf16, (1,OUT_PAD) f32 x2 (fused L3+proj)
                   out_ref):                  # (1, B, OUT_PAD) f32 Bernoulli probs (padded)
    def bn_coeffs(x, i):
        # nn.BatchNorm1d(1) on (B, 1, L), training mode: biased variance over
        # all B*L elements.  Returns (a, c) with BN(x) = a*x + c.
        n = float(x.size)
        mu = jnp.sum(x) / n
        var = jnp.maximum(jnp.sum(x * x) / n - mu * mu, 0.0)
        a = bn_ref[2 * i] * jax.lax.rsqrt(var + EPS)
        return a, bn_ref[2 * i + 1] - a * mu

    # Layer 1: BN commuted through the Linear -> the matmul no longer depends on
    # the BN reduction, so MXU fill/drain overlaps the XLU reduce + EUP rsqrt.
    x = z_ref[0].astype(jnp.float32)                                   # (B, D)
    m = jnp.dot(x.astype(jnp.bfloat16), w1_ref[...],
                preferred_element_type=jnp.float32)
    a, c = bn_coeffs(x, 0)
    h = jnp.maximum(a * m + (c * s1_ref[...] + b1_ref[...]), 0.0)      # (B, 53)

    # Layer 2
    m = jnp.dot(h.astype(jnp.bfloat16), w2_ref[...],
                preferred_element_type=jnp.float32)
    a, c = bn_coeffs(h, 1)
    h = jnp.maximum(a * m + (c * s2_ref[...] + b2_ref[...]), 0.0)      # (B, 23)

    # Layer 3: Linear(23, 28F) fused with view @ projection + diag(diag_offset),
    # flattened and lane-padded to (B, OUT_PAD).
    m = jnp.dot(h.astype(jnp.bfloat16), wf_ref[...],
                preferred_element_type=jnp.float32)
    a, c = bn_coeffs(h, 2)
    fz = a * m + (c * sf_ref[...] + bf_ref[...])                       # (B, OUT_PAD)

    # sigmoid = 1 / (1 + exp(-fz)); exp and approx reciprocal both ride the EUP.
    out_ref[0] = pl.reciprocal(1.0 + jnp.exp(-fz), approx=True)


def init_params(key, D_latent, final_latent=11):
    ks = jax.random.split(key, 5)

    def linear(k, fan_in, fan_out):
        kw, kb = jax.random.split(k)
        bound = 1.0 / jnp.sqrt(fan_in)
        W = jax.random.uniform(kw, (fan_out, fan_in), jnp.float32, -bound, bound)
        b = jax.random.uniform(kb, (fan_out,), jnp.float32, -bound, bound)
        return W, b

    W1, b1 = linear(ks[0], D_latent, 53)
    W2, b2 = linear(ks[1], 53, 23)
    W3, b3 = linear(ks[2], 23, 28 * final_latent)
    # xavier_normal_ on a (final_latent, 28) parameter
    std = jnp.sqrt(2.0 / (final_latent + 28))
    projection = std * jax.random.normal(ks[3], (final_latent, 28), jnp.float32)
    diag_offset = 0.1 * jax.random.normal(ks[4], (28,), jnp.float32)
    # three BatchNorm1d(1): gamma=1, beta=0 at init
    bn = jnp.tile(jnp.array([[1.0, 0.0]], jnp.float32), (3, 1))
    return dict(W1=W1, b1=b1, W2=W2, b2=b2, W3=W3, b3=b3,
                projection=projection, diag_offset=diag_offset, bn=bn)


def fuse_params(params):
    """Build kernel arguments ONCE (exact L3+projection fusion, colsums, bf16 weights)."""
    F = params["projection"].shape[0]
    W3 = params["W3"]              # (28*F, 23)  PyTorch layout (out, in)
    b3 = params["b3"]              # (28*F,)
    proj = params["projection"]    # (F, 28)

    # W_fused[k, r*28+j] = sum_f W3[r*F+f, k] * proj[f, j]
    W_fused = jnp.einsum("rfk,fj->krj", W3.reshape(28, F, 23), proj).reshape(23, OUT_DIM)
    # b_fused[r*28+j]    = sum_f b3[r*F+f] * proj[f, j] + (r==j) * diag_offset[j]
    b_fused = (b3.reshape(28, F) @ proj
               + jnp.diag(params["diag_offset"])).reshape(1, OUT_DIM)

    # Pad lane dim 784 -> 896 so the kernel's final store is unmasked.
    pad = OUT_PAD - OUT_DIM
    W_fused = jnp.pad(W_fused, ((0, 0), (0, pad)))
    b_fused = jnp.pad(b_fused, ((0, 0), (0, pad)))

    W1T = params["W1"].T           # (D, 53)
    W2T = params["W2"].T           # (53, 23)

    return dict(
        bn=params["bn"].reshape(-1).astype(jnp.float32),                 # (6,) SMEM
        W1T=W1T.astype(jnp.bfloat16),
        s1=W1T.sum(axis=0, keepdims=True).astype(jnp.float32),           # colsum(W1T)
        b1=params["b1"][None, :].astype(jnp.float32),
        W2T=W2T.astype(jnp.bfloat16),
        s2=W2T.sum(axis=0, keepdims=True).astype(jnp.float32),           # colsum(W2T)
        b2=params["b2"][None, :].astype(jnp.float32),
        WF=W_fused.astype(jnp.bfloat16),
        sF=W_fused.sum(axis=0, keepdims=True).astype(jnp.float32),       # colsum(WF)
        bF=b_fused.astype(jnp.float32),
    )


def decoder_forward(fused, Z):
    """Bernoulli probabilities of the Decoder.

    Z: (B, D) for a single forward() call, or (G, B, D) for G independent calls
    fused into one launch (grid=(G,), weights resident in VMEM; each grid step
    uses its own batch statistics, exactly like G separate PyTorch calls).

    Returns (B, 1, 28, 28) or (G, B, 1, 28, 28).
    """
    single = Z.ndim == 2
    if single:
        Z = Z[None]
    G, B, D = Z.shape

    def weight_spec(shape):
        # Same block every grid step -> stays resident in VMEM (no re-DMA).
        return pl.BlockSpec(shape, lambda g: (0, 0))

    out = pl.pallas_call(
        decoder_kernel,
        out_shape=jax.ShapeDtypeStruct((G, B, OUT_PAD), jnp.float32),
        grid=(G,),
        in_specs=[
            pl.BlockSpec(memory_space=pltpu.MemorySpace.SMEM),           # bn (6,)
            pl.BlockSpec((1, B, D), lambda g: (g, 0, 0)),                # Z tile
            weight_spec((D, 53)), weight_spec((1, 53)), weight_spec((1, 53)),
            weight_spec((53, 23)), weight_spec((1, 23)), weight_spec((1, 23)),
            weight_spec((23, OUT_PAD)), weight_spec((1, OUT_PAD)), weight_spec((1, OUT_PAD)),
        ],
        out_specs=pl.BlockSpec((1, B, OUT_PAD), lambda g: (g, 0, 0)),
        compiler_params=pltpu.CompilerParams(dimension_semantics=("parallel",)),
    )(
        fused["bn"], Z.astype(jnp.float32),
        fused["W1T"], fused["s1"], fused["b1"],
        fused["W2T"], fused["s2"], fused["b2"],
        fused["WF"], fused["sF"], fused["bF"],
    )
    probs = out[..., :OUT_DIM].reshape(G, B, 1, 28, 28)
    return probs[0] if single else probs


def decoder_reference(params, Z):
    """Plain-JAX f32 reference mirroring the PyTorch forward (training-mode BN)."""
    def bn(x, g, b):
        mu = x.mean()
        var = ((x - mu) ** 2).mean()
        return (x - mu) / jnp.sqrt(var + EPS) * g + b

    x = bn(Z, params["bn"][0, 0], params["bn"][0, 1])
    h = jnp.maximum(x @ params["W1"].T + params["b1"], 0.0)
    h = bn(h, params["bn"][1, 0], params["bn"][1, 1])
    h = jnp.maximum(h @ params["W2"].T + params["b2"], 0.0)
    h = bn(h, params["bn"][2, 0], params["bn"][2, 1])
    h = h @ params["W3"].T + params["b3"]
    F = params["projection"].shape[0]
    fz = h.reshape(-1, 28, F) @ params["projection"] + jnp.diag(params["diag_offset"])
    return jax.nn.sigmoid(fz)[:, None, :, :]


if __name__ == "__main__":
    key = jax.random.PRNGKey(0)
    D_latent, final_latent, B, G = 32, 11, 8, 4

    pkey, zkey = jax.random.split(key)
    params = init_params(pkey, D_latent, final_latent)

    # Fused / bf16 kernel arguments are built once, outside the forward path.
    fused = fuse_params(params)
    fused = jax.tree_util.tree_map(jax.block_until_ready, fused)

    # bf16 MXU weights + BN-commuted (un-normalized) bf16 matmul inputs +
    # approx-reciprocal sigmoid epilogue -> allow ~1e-2 abs error on probabilities.
    TOL = 2e-2

    # --- single forward() call ---
    Z = jax.random.normal(zkey, (B, D_latent), jnp.float32)
    probs = decoder_forward(fused, Z)
    jax.block_until_ready(probs)
    assert probs.shape == (B, 1, 28, 28), probs.shape
    ref = decoder_reference(params, Z)
    err = float(jnp.max(jnp.abs(probs - ref)))
    assert err < TOL, err

    # --- G independent forward() calls fused into one launch (grid=(G,)) ---
    Zg = jax.random.normal(jax.random.fold_in(zkey, 1), (G, B, D_latent), jnp.float32)
    probs_g = decoder_forward(fused, Zg)
    jax.block_until_ready(probs_g)
    assert probs_g.shape == (G, B, 1, 28, 28), probs_g.shape
    ref_g = jnp.stack([decoder_reference(params, Zg[g]) for g in range(G)])
    err_g = float(jnp.max(jnp.abs(probs_g - ref_g)))
    assert err_g < TOL, err_g

    print("KERNEL_OK")
</pallas_src>

<mosaic_0001>
module attributes {stable_mosaic.version = 11 : i64} {
  func.func @decoder_kernel(%arg0: i32, %arg1: memref<6xf32, #tpu.memory_space<smem>>, %arg2: memref<1x8x32xf32, #tpu.memory_space<vmem>>, %arg3: memref<32x53xbf16, #tpu.memory_space<vmem>>, %arg4: memref<1x53xf32, #tpu.memory_space<vmem>>, %arg5: memref<1x53xf32, #tpu.memory_space<vmem>>, %arg6: memref<53x23xbf16, #tpu.memory_space<vmem>>, %arg7: memref<1x23xf32, #tpu.memory_space<vmem>>, %arg8: memref<1x23xf32, #tpu.memory_space<vmem>>, %arg9: memref<23x896xbf16, #tpu.memory_space<vmem>>, %arg10: memref<1x896xf32, #tpu.memory_space<vmem>>, %arg11: memref<1x896xf32, #tpu.memory_space<vmem>>, %arg12: memref<1x8x896xf32, #tpu.memory_space<vmem>>) attributes {dimension_semantics = [#tpu.dimension_semantics<parallel>], iteration_bounds = array<i64: 1>, scalar_prefetch = 0 : i64, scratch_operands = 0 : i64, tpu.core_type = #tpu.core_type<tc>, window_params = [{transform_indices = @transform_0, window_bounds = array<i64: 6>}, {transform_indices = @transform_1, window_bounds = array<i64: 1, 8, 32>}, {pipeline_mode = #tpu.pipeline_mode<synchronous>, transform_indices = @transform_2, window_bounds = array<i64: 32, 53>}, {pipeline_mode = #tpu.pipeline_mode<synchronous>, transform_indices = @transform_3, window_bounds = array<i64: 1, 53>}, {pipeline_mode = #tpu.pipeline_mode<synchronous>, transform_indices = @transform_4, window_bounds = array<i64: 1, 53>}, {pipeline_mode = #tpu.pipeline_mode<synchronous>, transform_indices = @transform_5, window_bounds = array<i64: 53, 23>}, {pipeline_mode = #tpu.pipeline_mode<synchronous>, transform_indices = @transform_6, window_bounds = array<i64: 1, 23>}, {pipeline_mode = #tpu.pipeline_mode<synchronous>, transform_indices = @transform_7, window_bounds = array<i64: 1, 23>}, {pipeline_mode = #tpu.pipeline_mode<synchronous>, transform_indices = @transform_8, window_bounds = array<i64: 23, 896>}, {pipeline_mode = #tpu.pipeline_mode<synchronous>, transform_indices = @transform_9, window_bounds = array<i64: 1, 896>}, {pipeline_mode = #tpu.pipeline_mode<synchronous>, transform_indices = @transform_10, window_bounds = array<i64: 1, 896>}, {transform_indices = @transform_11, window_bounds = array<i64: 1, 8, 896>}]} {
    %c0 = arith.constant 0 : index
    %c0_0 = arith.constant 0 : index
    %c0_1 = arith.constant 0 : index
    %0 = vector.load %arg2[%c0, %c0_0, %c0_1] : memref<1x8x32xf32, #tpu.memory_space<vmem>>, vector<1x8x32xf32>
    %1 = vector.shape_cast %0 : vector<1x8x32xf32> to vector<8x32xf32>
    %2 = arith.truncf %1 : vector<8x32xf32> to vector<8x32xbf16>
    %c0_2 = arith.constant 0 : index
    %c0_3 = arith.constant 0 : index
    %3 = vector.load %arg3[%c0_2, %c0_3] : memref<32x53xbf16, #tpu.memory_space<vmem>>, vector<32x53xbf16>
    %cst = arith.constant dense<0.000000e+00> : vector<8x53xf32>
    %4 = tpu.matmul %2, %3, %cst {dimension_numbers = #tpu.dot_dimension_numbers<[1], [0], [0], [1], [0, 0, 1, 1], [], []>} : vector<8x32xbf16>, vector<32x53xbf16>, vector<8x53xf32> -> vector<8x53xf32>
    %5 = vector.shape_cast %1 : vector<8x32xf32> to vector<1x8x32xf32>
    %cst_4 = arith.constant dense<0.000000e+00> : vector<1xf32>
    %6 = vector.multi_reduction <add>, %5, %cst_4 [1, 2] : vector<1x8x32xf32> to vector<1xf32>
    %7 = vector.shape_cast %6 : vector<1xf32> to vector<1x1x1xf32>
    %8 = vector.extract %7[0, 0, 0] : f32 from vector<1x1x1xf32>
    %cst_5 = arith.constant 2.560000e+02 : f32
    %9 = arith.divf %8, %cst_5 : f32
    %10 = arith.mulf %1, %1 : vector<8x32xf32>
    %11 = vector.shape_cast %10 : vector<8x32xf32> to vector<1x8x32xf32>
    %cst_6 = arith.constant dense<0.000000e+00> : vector<1xf32>
    %12 = vector.multi_reduction <add>, %11, %cst_6 [1, 2] : vector<1x8x32xf32> to vector<1xf32>
    %13 = vector.shape_cast %12 : vector<1xf32> to vector<1x1x1xf32>
    %14 = vector.extract %13[0, 0, 0] : f32 from vector<1x1x1xf32>
    %cst_7 = arith.constant 2.560000e+02 : f32
    %15 = arith.divf %14, %cst_7 : f32
    %16 = arith.mulf %9, %9 : f32
    %17 = arith.subf %15, %16 : f32
    %cst_8 = arith.constant 0.000000e+00 : f32
    %18 = arith.maximumf %17, %cst_8 : f32
    %c0_9 = arith.constant 0 : index
    %19 = memref.load %arg1[%c0_9] : memref<6xf32, #tpu.memory_space<smem>>
    %cst_10 = arith.constant 9.99999974E-6 : f32
    %20 = arith.addf %18, %cst_10 : f32
    %21 = math.rsqrt %20 : f32
    %22 = arith.mulf %19, %21 : f32
    %c1 = arith.constant 1 : index
    %23 = memref.load %arg1[%c1] : memref<6xf32, #tpu.memory_space<smem>>
    %24 = arith.mulf %22, %9 : f32
    %25 = arith.subf %23, %24 : f32
    %26 = vector.broadcast %22 : f32 to vector<8x53xf32>
    %27 = arith.mulf %26, %4 : vector<8x53xf32>
    %c0_11 = arith.constant 0 : index
    %c0_12 = arith.constant 0 : index
    %28 = vector.load %arg4[%c0_11, %c0_12] : memref<1x53xf32, #tpu.memory_space<vmem>>, vector<1x53xf32>
    %29 = vector.broadcast %25 : f32 to vector<1x53xf32>
    %30 = arith.mulf %29, %28 : vector<1x53xf32>
    %c0_13 = arith.constant 0 : index
    %c0_14 = arith.constant 0 : index
    %31 = vector.load %arg5[%c0_13, %c0_14] : memref<1x53xf32, #tpu.memory_space<vmem>>, vector<1x53xf32>
    %32 = arith.addf %30, %31 : vector<1x53xf32>
    %33 = vector.broadcast %32 : vector<1x53xf32> to vector<8x53xf32>
    %34 = arith.addf %27, %33 : vector<8x53xf32>
    %cst_15 = arith.constant 0.000000e+00 : f32
    %35 = vector.broadcast %cst_15 : f32 to vector<8x53xf32>
    %36 = arith.maximumf %34, %35 : vector<8x53xf32>
    %37 = arith.truncf %36 : vector<8x53xf32> to vector<8x53xbf16>
    %c0_16 = arith.constant 0 : index
    %c0_17 = arith.constant 0 : index
    %38 = vector.load %arg6[%c0_16, %c0_17] : memref<53x23xbf16, #tpu.memory_space<vmem>>, vector<53x23xbf16>
    %cst_18 = arith.constant dense<0.000000e+00> : vector<8x23xf32>
    %39 = tpu.matmul %37, %38, %cst_18 {dimension_numbers = #tpu.dot_dimension_numbers<[1], [0], [0], [1], [0, 0, 1, 1], [], []>} : vector<8x53xbf16>, vector<53x23xbf16>, vector<8x23xf32> -> vector<8x23xf32>
    %40 = vector.shape_cast %36 : vector<8x53xf32> to vector<1x8x53xf32>
    %cst_19 = arith.constant dense<0.000000e+00> : vector<1xf32>
    %41 = vector.multi_reduction <add>, %40, %cst_19 [1, 2] : vector<1x8x53xf32> to vector<1xf32>
    %42 = vector.shape_cast %41 : vector<1xf32> to vector<1x1x1xf32>
    %43 = vector.extract %42[0, 0, 0] : f32 from vector<1x1x1xf32>
    %cst_20 = arith.constant 4.240000e+02 : f32
    %44 = arith.divf %43, %cst_20 : f32
    %45 = arith.mulf %36, %36 : vector<8x53xf32>
    %46 = vector.shape_cast %45 : vector<8x53xf32> to vector<1x8x53xf32>
    %cst_21 = arith.constant dense<0.000000e+00> : vector<1xf32>
    %47 = vector.multi_reduction <add>, %46, %cst_21 [1, 2] : vector<1x8x53xf32> to vector<1xf32>
    %48 = vector.shape_cast %47 : vector<1xf32> to vector<1x1x1xf32>
    %49 = vector.extract %48[0, 0, 0] : f32 from vector<1x1x1xf32>
    %cst_22 = arith.constant 4.240000e+02 : f32
    %50 = arith.divf %49, %cst_22 : f32
    %51 = arith.mulf %44, %44 : f32
    %52 = arith.subf %50, %51 : f32
    %cst_23 = arith.constant 0.000000e+00 : f32
    %53 = arith.maximumf %52, %cst_23 : f32
    %c2 = arith.constant 2 : index
    %54 = memref.load %arg1[%c2] : memref<6xf32, #tpu.memory_space<smem>>
    %cst_24 = arith.constant 9.99999974E-6 : f32
    %55 = arith.addf %53, %cst_24 : f32
    %56 = math.rsqrt %55 : f32
    %57 = arith.mulf %54, %56 : f32
    %c3 = arith.constant 3 : index
    %58 = memref.load %arg1[%c3] : memref<6xf32, #tpu.memory_space<smem>>
    %59 = arith.mulf %57, %44 : f32
    %60 = arith.subf %58, %59 : f32
    %61 = vector.broadcast %57 : f32 to vector<8x23xf32>
    %62 = arith.mulf %61, %39 : vector<8x23xf32>
    %c0_25 = arith.constant 0 : index
    %c0_26 = arith.constant 0 : index
    %63 = vector.load %arg7[%c0_25, %c0_26] : memref<1x23xf32, #tpu.memory_space<vmem>>, vector<1x23xf32>
    %64 = vector.broadcast %60 : f32 to vector<1x23xf32>
    %65 = arith.mulf %64, %63 : vector<1x23xf32>
    %c0_27 = arith.constant 0 : index
    %c0_28 = arith.constant 0 : index
    %66 = vector.load %arg8[%c0_27, %c0_28] : memref<1x23xf32, #tpu.memory_space<vmem>>, vector<1x23xf32>
    %67 = arith.addf %65, %66 : vector<1x23xf32>
    %68 = vector.broadcast %67 : vector<1x23xf32> to vector<8x23xf32>
    %69 = arith.addf %62, %68 : vector<8x23xf32>
    %cst_29 = arith.constant 0.000000e+00 : f32
    %70 = vector.broadcast %cst_29 : f32 to vector<8x23xf32>
    %71 = arith.maximumf %69, %70 : vector<8x23xf32>
    %72 = arith.truncf %71 : vector<8x23xf32> to vector<8x23xbf16>
    %c0_30 = arith.constant 0 : index
    %c0_31 = arith.constant 0 : index
    %73 = vector.load %arg9[%c0_30, %c0_31] : memref<23x896xbf16, #tpu.memory_space<vmem>>, vector<23x896xbf16>
    %cst_32 = arith.constant dense<0.000000e+00> : vector<8x896xf32>
    %74 = tpu.matmul %72, %73, %cst_32 {dimension_numbers = #tpu.dot_dimension_numbers<[1], [0], [0], [1], [0, 0, 1, 1], [], []>} : vector<8x23xbf16>, vector<23x896xbf16>, vector<8x896xf32> -> vector<8x896xf32>
    %75 = vector.shape_cast %71 : vector<8x23xf32> to vector<1x8x23xf32>
    %cst_33 = arith.constant dense<0.000000e+00> : vector<1xf32>
    %76 = vector.multi_reduction <add>, %75, %cst_33 [1, 2] : vector<1x8x23xf32> to vector<1xf32>
    %77 = vector.shape_cast %76 : vector<1xf32> to vector<1x1x1xf32>
    %78 = vector.extract %77[0, 0, 0] : f32 from vector<1x1x1xf32>
    %cst_34 = arith.constant 1.840000e+02 : f32
    %79 = arith.divf %78, %cst_34 : f32
    %80 = arith.mulf %71, %71 : vector<8x23xf32>
    %81 = vector.shape_cast %80 : vector<8x23xf32> to vector<1x8x23xf32>
    %cst_35 = arith.constant dense<0.000000e+00> : vector<1xf32>
    %82 = vector.multi_reduction <add>, %81, %cst_35 [1, 2] : vector<1x8x23xf32> to vector<1xf32>
    %83 = vector.shape_cast %82 : vector<1xf32> to vector<1x1x1xf32>
    %84 = vector.extract %83[0, 0, 0] : f32 from vector<1x1x1xf32>
    %cst_36 = arith.constant 1.840000e+02 : f32
    %85 = arith.divf %84, %cst_36 : f32
    %86 = arith.mulf %79, %79 : f32
    %87 = arith.subf %85, %86 : f32
    %cst_37 = arith.constant 0.000000e+00 : f32
    %88 = arith.maximumf %87, %cst_37 : f32
    %c4 = arith.constant 4 : index
    %89 = memref.load %arg1[%c4] : memref<6xf32, #tpu.memory_space<smem>>
    %cst_38 = arith.constant 9.99999974E-6 : f32
    %90 = arith.addf %88, %cst_38 : f32
    %91 = math.rsqrt %90 : f32
    %92 = arith.mulf %89, %91 : f32
    %c5 = arith.constant 5 : index
    %93 = memref.load %arg1[%c5] : memref<6xf32, #tpu.memory_space<smem>>
    %94 = arith.mulf %92, %79 : f32
    %95 = arith.subf %93, %94 : f32
    %96 = vector.broadcast %92 : f32 to vector<8x896xf32>
    %97 = arith.mulf %96, %74 : vector<8x896xf32>
    %c0_39 = arith.constant 0 : index
    %c0_40 = arith.constant 0 : index
    %98 = vector.load %arg10[%c0_39, %c0_40] : memref<1x896xf32, #tpu.memory_space<vmem>>, vector<1x896xf32>
    %99 = vector.broadcast %95 : f32 to vector<1x896xf32>
    %100 = arith.mulf %99, %98 : vector<1x896xf32>
    %c0_41 = arith.constant 0 : index
    %c0_42 = arith.constant 0 : index
    %101 = vector.load %arg11[%c0_41, %c0_42] : memref<1x896xf32, #tpu.memory_space<vmem>>, vector<1x896xf32>
    %102 = arith.addf %100, %101 : vector<1x896xf32>
    %103 = vector.broadcast %102 : vector<1x896xf32> to vector<8x896xf32>
    %104 = arith.addf %97, %103 : vector<8x896xf32>
    %cst_43 = arith.constant 0.000000e+00 : f32
    %105 = vector.broadcast %cst_43 : f32 to vector<8x896xf32>
    %106 = arith.subf %105, %104 : vector<8x896xf32>
    %107 = math.exp %106 : vector<8x896xf32>
    %cst_44 = arith.constant 1.000000e+00 : f32
    %108 = vector.broadcast %cst_44 : f32 to vector<8x896xf32>
    %109 = arith.addf %108, %107 : vector<8x896xf32>
    %110 = tpu.reciprocal %109 {approx = true} : vector<8x896xf32> -> vector<8x896xf32>
    %c0_45 = arith.constant 0 : index
    %c0_46 = arith.constant 0 : index
    %c0_47 = arith.constant 0 : index
    %111 = vector.load %arg12[%c0_45, %c0_46, %c0_47] : memref<1x8x896xf32, #tpu.memory_space<vmem>>, vector<1x8x896xf32>
    %112 = vector.shape_cast %111 : vector<1x8x896xf32> to vector<8x896xf32>
    %113 = vector.shape_cast %110 : vector<8x896xf32> to vector<1x8x896xf32>
    tpu.vector_store %arg12[%c0_45, %c0_46, %c0_47], %113 {strides = array<i32>} : memref<1x8x896xf32, #tpu.memory_space<vmem>>, vector<1x8x896xf32>,
    return
  }
  func.func @transform_0(%arg0: i32) -> i32 {
    %c0_i32 = arith.constant 0 : i32
    %c0_i32_0 = arith.constant 0 : i32
    return %c0_i32 : i32
  }
  func.func @transform_1(%arg0: i32) -> (i32, i32, i32) {
    %c0_i32 = arith.constant 0 : i32
    %c0_i32_0 = arith.constant 0 : i32
    %c0_i32_1 = arith.constant 0 : i32
    return %arg0, %c0_i32, %c0_i32_0 : i32, i32, i32
  }
  func.func @transform_2(%arg0: i32) -> (i32, i32) {
    %c0_i32 = arith.constant 0 : i32
    %c0_i32_0 = arith.constant 0 : i32
    %c0_i32_1 = arith.constant 0 : i32
    return %c0_i32, %c0_i32_0 : i32, i32
  }
  func.func @transform_3(%arg0: i32) -> (i32, i32) {
    %c0_i32 = arith.constant 0 : i32
    %c0_i32_0 = arith.constant 0 : i32
    %c0_i32_1 = arith.constant 0 : i32
    return %c0_i32, %c0_i32_0 : i32, i32
  }
  func.func @transform_4(%arg0: i32) -> (i32, i32) {
    %c0_i32 = arith.constant 0 : i32
    %c0_i32_0 = arith.constant 0 : i32
    %c0_i32_1 = arith.constant 0 : i32
    return %c0_i32, %c0_i32_0 : i32, i32
  }
  func.func @transform_5(%arg0: i32) -> (i32, i32) {
    %c0_i32 = arith.constant 0 : i32
    %c0_i32_0 = arith.constant 0 : i32
    %c0_i32_1 = arith.constant 0 : i32
    return %c0_i32, %c0_i32_0 : i32, i32
  }
  func.func @transform_6(%arg0: i32) -> (i32, i32) {
    %c0_i32 = arith.constant 0 : i32
    %c0_i32_0 = arith.constant 0 : i32
    %c0_i32_1 = arith.constant 0 : i32
    return %c0_i32, %c0_i32_0 : i32, i32
  }
  func.func @transform_7(%arg0: i32) -> (i32, i32) {
    %c0_i32 = arith.constant 0 : i32
    %c0_i32_0 = arith.constant 0 : i32
    %c0_i32_1 = arith.constant 0 : i32
    return %c0_i32, %c0_i32_0 : i32, i32
  }
  func.func @transform_8(%arg0: i32) -> (i32, i32) {
    %c0_i32 = arith.constant 0 : i32
    %c0_i32_0 = arith.constant 0 : i32
    %c0_i32_1 = arith.constant 0 : i32
    return %c0_i32, %c0_i32_0 : i32, i32
  }
  func.func @transform_9(%arg0: i32) -> (i32, i32) {
    %c0_i32 = arith.constant 0 : i32
    %c0_i32_0 = arith.constant 0 : i32
    %c0_i32_1 = arith.constant 0 : i32
    return %c0_i32, %c0_i32_0 : i32, i32
  }
  func.func @transform_10(%arg0: i32) -> (i32, i32) {
    %c0_i32 = arith.constant 0 : i32
    %c0_i32_0 = arith.constant 0 : i32
    %c0_i32_1 = arith.constant 0 : i32
    return %c0_i32, %c0_i32_0 : i32, i32
  }
  func.func @transform_11(%arg0: i32) -> (i32, i32, i32) {
    %c0_i32 = arith.constant 0 : i32
    %c0_i32_0 = arith.constant 0 : i32
    %c0_i32_1 = arith.constant 0 : i32
    return %arg0, %c0_i32, %c0_i32_0 : i32, i32, i32
  }
}

</mosaic_0001>

<bundles_post_ra>
// kernel: tpu_custom_call.1
= control target key start
LH: loop header
LB: loop body
LE: loop exit
PB: predicated region body
PF: predicated region fallthrough
CT: control target
= control target key end

     0   :  { %16 = vsyncpa [#allocation5], 0  ;;  %s1110_s0 = inlined_call_operand.vmem [shape: f32[6], index: 0, kind: input, shape index: {}]   ;;  %s1111_s1 = inlined_call_operand.vmem [shape: f32[1,8,32], index: 1, kind: input, shape index: {}]   ;;  %s1112_s2 = inlined_call_operand.vmem [shape: bf16[32,53], index: 2, kind: input, shape index: {}]   ;;  %s1113_s3 = inlined_call_operand.vmem [shape: f32[1,53], index: 3, kind: input, shape index: {}]   ;;  %s1114_s4 = inlined_call_operand.vmem [shape: f32[1,53], index: 4, kind: input, shape index: {}]   ;;  %s1115_s5 = inlined_call_operand.vmem [shape: bf16[53,23], index: 5, kind: input, shape index: {}]   ;;  %s1116_s6 = inlined_call_operand.vmem [shape: f32[1,23], index: 6, kind: input, shape index: {}]   ;;  %s1117_s7 = inlined_call_operand.vmem [shape: f32[1,23], index: 7, kind: input, shape index: {}]   ;;  %s1118_s8 = inlined_call_operand.hbm [shape: bf16[23,896], index: 8, kind: input, shape index: {}]   ;;  %s1119_s9 = inlined_call_operand.vmem [shape: f32[1,896], index: 9, kind: input, shape index: {}]   ;;  %s1120_s10 = inlined_call_operand.vmem [shape: f32[1,896], index: 10, kind: input, shape index: {}]   ;;  %s1121_s11 = inlined_call_operand.hbm [shape: f32[1,8,896], index: 11, kind: output, shape index: {}]  }
   0x1   :  { %17 = vsyncpa [#allocation3], 0 }
   0x2   :  { %18 = vsyncpa [#allocation4], 0  ;;  %s25_s19 = sshll.u32 %s1110_s0, 4  ;;  %s26_s19 = int_to_ptr.vmem [resolvable:$true] %s25_s19 }
   0x3   :  { %s883_s20 = scalar_lea.vmem %s26_s19, 16  ;;  %p888_p1 = scmp.lt.s32.totalorder %s26_s19, %s26_s19 }
   0x4   :  { %p884_p0 = scmp.ne.s32.totalorder %s26_s19, %s883_s20  ;;  %p889_p2 = scmp.lt.s32.totalorder %s883_s20, %s883_s20 }
   0x6   :  { %p890_p3 = por %p889_p2, %p888_p1 }
   0x8   :  { %p891_p4 = pnand %p890_p3, %p884_p0 }
   0xa   :  { %894 = shalt.err (!%p891_p4)
}
   0xb   :  { %s941_s21 = smov [#allocation2]   ;;  %s942_s22 = smov [#allocation6]  }
   0xc   :  { %28 = dma.vmem_to_smem %s26_s19, 16, %s941_s21, [#allocation5]  }
   0xd   :  { %s48_s23 = sshll.u32 %s942_s22, 4  ;;  %s49_s23 = int_to_ptr.vmem [resolvable:$true] %s48_s23 }
   0xe   :  { %s903_s24 = scalar_lea.vmem %s49_s23, 1344  ;;  %p908_p6 = scmp.lt.s32.totalorder %s49_s23, %s49_s23 }
   0xf   :  { %p904_p5 = scmp.ne.s32.totalorder %s49_s23, %s903_s24  ;;  %p909_p7 = scmp.lt.s32.totalorder %s903_s24, %s903_s24 }
  0x11   :  { %p910_p8 = por %p909_p7, %p908_p6 }
  0x13   :  { %p911_p9 = pnand %p910_p8, %p904_p5 }
  0x15   :  { %914 = shalt.err (!%p911_p9)
}
  0x16   :  { %s943_s0 = smov 448   ;;  %s944_s25 = smov 28  }
  0x17   :  { %54 = dma.hbm_to_vmem [thread:$0]  %s1118_s8, 1344, %s49_s23, [#allocation3], %s943_s0, %s943_s0, %s944_s25  }
  0x18   :  { %935 = dma.done.wait [#allocation5], 16  }
  0x19   :  { %936 = vsyncadd [#allocation5], 4294967280 }
  0x1a   :  { %937 = dma.done.wait [#allocation3], 1344  }
  0x1b   :  { %938 = vsyncadd [#allocation3], 4294965952 }
  0x1c   :  { %65 = sfence }
  0x1d   :  { %v67_v0 = vld [vmem:[%s1111_s1] sm:$0xff]  ;;  %vm85_vm0 = vcmask 261120   ;;  %v826_v1 = vld [vmem:[%s1112_s2 + $0x8] sm:$0xff]   ;;  %v945_v4 = vmov 0.0   ;;  %vm946_vm1 = vmmov 0   ;;  %vm216_vm2 = vcmask 1041408  }
  0x1e   :  { %v129_v2 = vsel %vm85_vm0, %v67_v0, 0.0  ;;  %v142_v3 = vmul.f32 %v67_v0, %v67_v0  ;;  %770 = vmatprep.subr.bf16.mxu0 %v945_v4  ;;  %v827_v5 = vld [vmem:[%s1112_s2] sm:$0xff]   ;;  %778 = vmatprep.subr.bf16.mxu1 %v945_v4  ;;  %v68_v7 = vpack.c.bf16 %v67_v0, %v67_v0  ;;  %v828_v20 = vld [vmem:[%s1115_s5 + $0x18] ss:$0 sps:$4 sm:$0x77]   ;;  %vm217_vm3 = vcmask 1042432  }
  0x1f   :  { %130 = vadd.xlane.f32.xlu0 %v129_v2  ;;  %771 = vmatpush3.bf16.msra.mxu0 %v826_v1  ;;  %v947_v21 = vmov 65535   ;;  %v829_v27 = vld [vmem:[%s1115_s5 + $0x10] sm:$0xff]   ;;  %v830_v28 = vld [vmem:[%s1115_s5 + $0x8] sm:$0xff]   ;;  %v831_v29 = vld [vmem:[%s1115_s5] sm:$0xff]   ;;  %s948_s25 = smov 0.0   ;;  %s159_s5 = sld [smem:[#allocation2]]  ;;  %v176_v37 = vlaneseq }
  0x20   :  { %v143_v6 = vsel %vm85_vm0, %v142_v3, 0.0  ;;  %772 = vmatprep.subr.bf16.mxu0 %v945_v4  ;;  %774 = vmatprep.mubr.msk.bf16.mxu0 %vm946_vm1, %v945_v4  ;;  %v218_v22 = vsel %vm216_vm2, 4294967295, %v947_v21  ;;  %v389_v30 = vsel %vm217_vm3, 4294967295, %v947_v21  ;;  %s731_s28 = sld [smem:[#allocation2 + $0x1]]  ;;  %v170_v39 = vld [vmem:[%s1113_s3] sm:$0x1] }
  0x21   :  { %786 = vmatprep.mubr.msk.bf16.mxu1 %vm946_vm1, %v945_v4  ;;  %v219_v23 = vsel %vm217_vm3, %v218_v22, 0  ;;  %v1054_v38 = vshrl.u32 %v176_v37, 7  ;;  %v173_v41 = vld [vmem:[%s1114_s4] sm:$0x1]  ;;  %vm212_vm4 = vcmask 433152   ;;  %vm388_vm5 = vcmask 1043456  }
  0x22   :  { %v221_v25 = vand.u32 %v828_v20, %v219_v23  ;;  %v949_v20 = vmov 0   ;;  %v327_v21 = vld [vmem:[#allocation6 + $0x40] sm:$0xff]  ;;  %vm384_vm6 = vcmask 187392   ;;  %s757_s14 = sld [smem:[#allocation2 + $0x4]] }
  0x23   :  { %144 = vadd.xlane.f32.xlu0 %v143_v6  ;;  %773 = vmatpush3.bf16.msra.mxu0 %v827_v5  ;;  %v1063_v43 = vsub.s32 0, %v1054_v38  ;;  %v1066_v5 = vsel %vm388_vm5, %v389_v30, 0  ;;  %v326_v6 = vld [vmem:[#allocation6 + $0x38] sm:$0xff]  ;;  %v749_v22 = vcombine.high %v327_v21, %v327_v21  ;;  %v748_v23 = vcombine.low %v327_v21, %v327_v21  ;;  %v622_v21 = vld [vmem:[%s1119_s9] sm:$0xff]  ;;  %s950_s9 = smov [#allocation7]  }
  0x24   :  { %779 = vmatpush3.bf16.msra.mxu1 %v221_v25 }
  0x25   :  { %780 = vmatprep.subr.bf16.mxu1 %v945_v4  ;;  %v398_v25 = vand.u32 %v748_v23, %v1066_v5 }
  0x26   :  { %775 = vmatmul.mubr.msk.bf16.vlgmr.msra.gmra.mxu0 %vm85_vm0, %v68_v7  ;;  %v328_v7 = vld [vmem:[#allocation6 + $0x48] sm:$0xff] }
  0x27   :  { %444 = vmatprep.mubr.bf16.mxu0 %v949_v20 }
  0x28   :  { %781 = vmatpush3.bf16.msra.mxu1 %v829_v27 }
  0x29   :  { %782 = vmatprep.subr.bf16.mxu1 %v945_v4 }
  0x2c   :  { %783 = vmatpush3.bf16.msra.mxu1 %v830_v28 }
  0x2d   :  { %784 = vmatprep.subr.bf16.mxu1 %v945_v4 }
  0x30   :  { %785 = vmatpush3.bf16.msra.mxu1 %v831_v29 }
  0xa8   :  { %v131_v8 = vpop.xlane.xlu0 %130 }
  0xa9   :  { %v132_v9 = vrot.slane %v131_v8, 4 }
  0xab   :  { %v133_v10 = vadd.f32 %v132_v9, %v131_v8  ;;  %v747_v8 = vcombine.high %v326_v6, %v326_v6  ;;  %v751_v9 = vcombine.high %v328_v7, %v328_v7 }
  0xac   :  { %v145_v11 = vpop.xlane.xlu0 %144 }
  0xad   :  { %v134_v12 = vrot.slane %v133_v10, 2  ;;  %v146_v13 = vrot.slane %v145_v11, 4 }
  0xaf   :  { %v147_v14 = vadd.f32 %v146_v13, %v145_v11  ;;  %v135_v15 = vadd.f32 %v134_v12, %v133_v10  ;;  %v746_v10 = vcombine.low %v326_v6, %v326_v6  ;;  %v750_v11 = vcombine.low %v328_v7, %v328_v7 }
  0xb0   :  { %v395_v12 = vand.u32 %v747_v8, %v1066_v5  ;;  %v407_v13 = vand.u32 %v751_v9, %v1066_v5 }
  0xb1   :  { %v148_v16 = vrot.slane %v147_v14, 2  ;;  %v136_v17 = vrot.slane %v135_v15, 1 }
  0xb2   :  { %424 = vmatprep.subr.bf16.mxu0 %v395_v12  ;;  %506 = vmatprep.subr.bf16.mxu1 %v407_v13 }
  0xb3   :  { %v137_v18 = vadd.f32 %v136_v17, %v135_v15  ;;  %v149_v19 = vadd.f32 %v148_v16, %v147_v14  ;;  %v838_v14 = vld [vmem:[#allocation6 + $0x4] ss:$28 sps:$4 sm:$0xff]   ;;  %v392_v15 = vand.u32 %v746_v10, %v1066_v5  ;;  %v404_v16 = vand.u32 %v750_v11, %v1066_v5  ;;  %v841_v17 = vld [vmem:[#allocation6 + $0x14] ss:$28 sps:$4 sm:$0xff]  }
  0xb5   :  { %798 = vpush %v137_v18  ;;  %v150_v24 = vrot.slane %v149_v19, 1  ;;  %425 = vmatpush1.bf16.msra.mxu0 %v392_v15  ;;  %v836_v18 = vld [vmem:[#allocation6] ss:$28 sps:$4 sm:$0xff]  }
  0xb6   :  { %426 = vmatprep.subr.bf16.mxu0 %v838_v14 }
  0xb7   :  { %v151_v26 = vadd.f32 %v150_v24, %v149_v19  ;;  %v839_v19 = vld [vmem:[#allocation6 + $0x10] ss:$28 sps:$4 sm:$0xff]   ;;  %v401_v24 = vand.u32 %v749_v22, %v1066_v5 }
  0xb9   :  { %800 = vpush %v151_v26  ;;  %427 = vmatpush1.bf16.msra.mxu0 %v836_v18 }
  0xba   :  { %465 = vmatprep.subr.bf16.mxu0 %v401_v24  ;;  %v625_v24 = vld [vmem:[%s1120_s10] sm:$0xff]  ;;  %s718_s10 = sshll.u32 %s950_s9, 4  ;;  %s719_s10 = int_to_ptr.vmem [resolvable:$true] %s718_s10 }
  0xbb   :  { %p920_p11 = scmp.lt.s32.totalorder %s719_s10, %s719_s10 }
  0xe6   :  { %s799_s20 = spop %798  ;;  %v123_v31 = vpop.f32.mrf.mxu0 }
  0xe7   :  { %s141_s21 = smul.f32 0.00390625, %s799_s20 }
  0xe8   :  { %v776_v32 = vpop.f32.mrf.mxu0 }
  0xe9   :  { %s156_s22 = smul.f32 %s141_s21, %s141_s21  ;;  %v304_v32 = vld [vmem:[%s1116_s6] sm:$0x1] }
  0xea   :  { %s801_s23 = spop %800  ;;  %v126_v33 = vpop.f32.mrf.mxu0 }
  0xeb   :  { %s155_s24 = smul.f32 0.00390625, %s801_s23 }
  0xec   :  { %v777_v34 = vpop.f32.mrf.mxu0 }
  0xed   :  { %s157_s0 = ssub.f32 %s155_s24, %s156_s22  ;;  %v307_v34 = vld [vmem:[%s1117_s7] sm:$0x1] }
  0xee   :  { %s738_s22 = sld [smem:[#allocation2 + $0x3]] }
  0xef   :  { %s158_s26 = smax.f32 %s948_s25, %s157_s0 }
  0xf0   :  { %s160_s27 = sadd.f32 1e-05, %s158_s26 }
  0xf2   :  { %v161_v35 = vstv %s160_s27 }
  0xf3   :  { %849 = vrsqrt.f32 %v161_v35 }
 0x100   :  { %v850_v36 = vpop.eup %849 }
 0x101   :  { %802 = vpush %v850_v36 }
 0x132   :  { %s803_s29 = spop %802 }
 0x133   :  { %s164_s30 = smul.f32 %s803_s29, %s159_s5 }
 0x135   :  { %s166_s12 = smul.f32 %s164_s30, %s141_s21  ;;  %v168_v44 = vstv %s164_s30  ;;  %s737_s21 = sld [smem:[#allocation2 + $0x2]] }
 0x136   :  { %v169_v46 = vmul.f32 %v168_v44, %v123_v31 }
 0x137   :  { %s167_s8 = ssub.f32 %s731_s28, %s166_s12 }
 0x139   :  { %v171_v40 = vstv %s167_s8 }
 0x13a   :  { %v172_v42 = vmul.f32 %v171_v40, %v170_v39 }
 0x13c   :  { %v174_v45 = vadd.f32 %v173_v41, %v172_v42 }
 0x13e   :  { %v179_v47 = vrot.slane %v174_v45, %v1063_v43 }
 0x140   :  { %v181_v48 = vadd.f32 %v179_v47, %v169_v46  ;;  %v846_v47 = vld [vmem:[#allocation6 + $0xc] ss:$28 sps:$4 sm:$0xff]  }
 0x142   :  { %v182_v49 = vmax.f32 %v181_v48, 0.0 }
 0x144   :  { %v263_v50 = vsel %vm212_vm4, %v182_v49, 0.0  ;;  %v183_v51 = vpack.c.bf16 %v182_v49, %v182_v49  ;;  %v276_v52 = vmul.f32 %v182_v49, %v182_v49  ;;  %v844_v49 = vld [vmem:[#allocation6 + $0x8] ss:$28 sps:$4 sm:$0xff]  }
 0x145   :  { %264 = vadd.xlane.f32.xlu1 %v263_v50  ;;  %v847_v50 = vld [vmem:[#allocation6 + $0x50] ss:$0 sps:$4 sm:$0xff]  }
 0x146   :  { %787 = vmatmul.mubr.msk.bf16.vlgmr.msra.gmra.mxu1 %vm212_vm4, %v183_v51  ;;  %v277_v53 = vsel %vm212_vm4, %v276_v52, 0.0  ;;  %v410_v51 = vand.u32 %v847_v50, %v1066_v5  ;;  %v848_v52 = vld [vmem:[#allocation6 + $0x18] ss:$28 sps:$4 sm:$0xff]  }
 0x147   :  { %507 = vmatpush1.bf16.msra.mxu1 %v404_v16  ;;  %526 = vmatprep.mubr.bf16.mxu1 %v949_v20 }
 0x148   :  { %508 = vmatprep.subr.bf16.mxu1 %v841_v17 }
 0x149   :  { %278 = vadd.xlane.f32.xlu1 %v277_v53 }
 0x14b   :  { %509 = vmatpush1.bf16.msra.mxu1 %v839_v19 }
 0x1ce   :  { %v265_v54 = vpop.xlane.xlu1 %264 }
 0x1cf   :  { %v266_v55 = vrot.slane %v265_v54, 4 }
 0x1d1   :  { %v267_v56 = vadd.f32 %v266_v55, %v265_v54 }
 0x1d2   :  { %v279_v57 = vpop.xlane.xlu1 %278 }
 0x1d3   :  { %v268_v58 = vrot.slane %v267_v56, 2  ;;  %v280_v59 = vrot.slane %v279_v57, 4 }
 0x1d5   :  { %v281_v60 = vadd.f32 %v280_v59, %v279_v57  ;;  %v269_v61 = vadd.f32 %v268_v58, %v267_v56 }
 0x1d7   :  { %v282_v62 = vrot.slane %v281_v60, 2  ;;  %v270_v63 = vrot.slane %v269_v61, 1 }
 0x1d9   :  { %v271_v0 = vadd.f32 %v270_v63, %v269_v61  ;;  %v283_v1 = vadd.f32 %v282_v62, %v281_v60 }
 0x1db   :  { %804 = vpush %v271_v0  ;;  %v284_v2 = vrot.slane %v283_v1, 1 }
 0x1dd   :  { %v285_v3 = vadd.f32 %v284_v2, %v283_v1 }
 0x1df   :  { %806 = vpush %v285_v3 }
 0x206   :  { %v257_v26 = vpop.f32.mrf.mxu1 }
 0x208   :  { %v788_v27 = vpop.f32.mrf.mxu1 }
 0x209   :  { %v638_v27 = vsub.s32 2, %v1054_v38 }
 0x20a   :  { %v260_v28 = vpop.f32.mrf.mxu1 }
 0x20b   :  { %v642_v28 = vsub.s32 3, %v1054_v38 }
 0x20c   :  { %v789_v29 = vpop.f32.mrf.mxu1  ;;  %s805_s3 = spop %804 }
 0x20d   :  { %s275_s4 = smul.f32 0.0023584906, %s805_s3  ;;  %s758_s3 = sld [smem:[#allocation2 + $0x5]]  ;;  %v646_v29 = vsub.s32 4, %v1054_v38 }
 0x20f   :  { %s290_s15 = smul.f32 %s275_s4, %s275_s4 }
 0x210   :  { %s807_s16 = spop %806 }
 0x211   :  { %s289_s17 = smul.f32 0.0023584906, %s807_s16 }
 0x213   :  { %s291_s18 = ssub.f32 %s289_s17, %s290_s15 }
 0x215   :  { %s292_s19 = smax.f32 %s948_s25, %s291_s18 }
 0x216   :  { %s294_s20 = sadd.f32 1e-05, %s292_s19 }
 0x218   :  { %v295_v30 = vstv %s294_s20 }
 0x219   :  { %851 = vrsqrt.f32 %v295_v30  ;;  %v650_v30 = vsub.s32 5, %v1054_v38 }
 0x226   :  { %v852_v31 = vpop.eup %851 }
 0x227   :  { %808 = vpush %v852_v31  ;;  %v654_v31 = vsub.s32 6, %v1054_v38 }
 0x258   :  { %s809_s23 = spop %808 }
 0x259   :  { %s298_s24 = smul.f32 %s809_s23, %s737_s21  ;;  %s915_s21 = scalar_lea.vmem %s719_s10, 896 }
 0x25a   :  { %p916_p10 = scmp.ne.s32.totalorder %s719_s10, %s915_s21  ;;  %p921_p12 = scmp.lt.s32.totalorder %s915_s21, %s915_s21 }
 0x25b   :  { %s300_s0 = smul.f32 %s298_s24, %s275_s4  ;;  %v302_v36 = vstv %s298_s24 }
 0x25c   :  { %v303_v39 = vmul.f32 %v302_v36, %v257_v26  ;;  %v634_v26 = vsub.s32 1, %v1054_v38  ;;  %p922_p13 = por %p921_p12, %p920_p11 }
 0x25d   :  { %s301_s26 = ssub.f32 %s738_s22, %s300_s0 }
 0x25e   :  { %p923_p0 = pnand %p922_p13, %p916_p10 }
 0x25f   :  { %v305_v33 = vstv %s301_s26 }
 0x260   :  { %v306_v35 = vmul.f32 %v305_v33, %v304_v32 }
 0x262   :  { %v308_v37 = vadd.f32 %v307_v34, %v306_v35 }
 0x264   :  { %v313_v40 = vrot.slane %v308_v37, %v1063_v43 }
 0x266   :  { %v315_v41 = vadd.f32 %v313_v40, %v303_v39 }
 0x268   :  { %v316_v42 = vmax.f32 %v315_v41, 0.0 }
 0x26a   :  { %v575_v44 = vsel %vm384_vm6, %v316_v42, 0.0  ;;  %v317_v45 = vpack.c.bf16 %v316_v42, %v316_v42  ;;  %v588_v46 = vmul.f32 %v316_v42, %v316_v42 }
 0x26b   :  { %576 = vadd.xlane.f32.xlu0 %v575_v44 }
 0x26c   :  { %753 = vmatmul.mubr.msk.bf16.vlgmr.msra.gmra.mxu0 %vm384_vm6, %v317_v45  ;;  %755 = vmatmul.mubr.msk.bf16.vlgmr.msra.gmra.mxu1 %vm384_vm6, %v317_v45  ;;  %v589_v48 = vsel %vm384_vm6, %v588_v46, 0.0 }
 0x26d   :  { %590 = vadd.xlane.f32.xlu1 %v589_v48  ;;  %466 = vmatpush1.bf16.msra.mxu0 %v398_v25 }
 0x26e   :  { %467 = vmatprep.subr.bf16.mxu0 %v846_v47  ;;  %485 = vmatprep.mubr.bf16.mxu0 %v949_v20 }
 0x271   :  { %468 = vmatpush1.bf16.msra.mxu0 %v844_v49 }
 0x272   :  { %790 = vmatprep.subr.bf16.mxu0 %v945_v4 }
 0x274   :  { %754 = vmatmul.mubr.msk.bf16.vlgmr.msra.gmra.mxu0 %vm384_vm6, %v317_v45 }
 0x275   :  { %791 = vmatpush3.bf16.msra.mxu0 %v410_v51  ;;  %794 = vmatprep.mubr.msk.bf16.mxu0 %vm946_vm1, %v945_v4 }
 0x276   :  { %792 = vmatprep.subr.bf16.mxu0 %v945_v4 }
 0x279   :  { %793 = vmatpush3.bf16.msra.mxu0 %v848_v52 }
 0x27c   :  { %795 = vmatmul.mubr.msk.bf16.vlgmr.msra.gmra.mxu0 %vm384_vm6, %v317_v45 }
 0x2f4   :  { %v577_v53 = vpop.xlane.xlu0 %576 }
 0x2f5   :  { %v578_v54 = vrot.slane %v577_v53, 4 }
 0x2f6   :  { %v591_v55 = vpop.xlane.xlu1 %590 }
 0x2f7   :  { %v579_v56 = vadd.f32 %v578_v54, %v577_v53  ;;  %v592_v57 = vrot.slane %v591_v55, 4 }
 0x2f9   :  { %v580_v58 = vrot.slane %v579_v56, 2  ;;  %v593_v59 = vadd.f32 %v592_v57, %v591_v55 }
 0x2fb   :  { %v581_v60 = vadd.f32 %v580_v58, %v579_v56  ;;  %v594_v61 = vrot.slane %v593_v59, 2 }
 0x2fd   :  { %v595_v62 = vadd.f32 %v594_v61, %v593_v59  ;;  %v582_v63 = vrot.slane %v581_v60, 1 }
 0x2ff   :  { %v583_v0 = vadd.f32 %v582_v63, %v581_v60  ;;  %v596_v1 = vrot.slane %v595_v62, 1 }
 0x301   :  { %810 = vpush %v583_v0  ;;  %v597_v2 = vadd.f32 %v596_v1, %v595_v62 }
 0x303   :  { %812 = vpush %v597_v2 }
 0x32c   :  { %v446_v4 = vpop.f32.mrf.mxu0  ;;  %v528_v3 = vpop.f32.mrf.mxu1 }
 0x32e   :  { %v448_v5 = vpop.f32.mrf.mxu0  ;;  %v530_v6 = vpop.f32.mrf.mxu1 }
 0x330   :  { %v450_v7 = vpop.f32.mrf.mxu0  ;;  %v532_v8 = vpop.f32.mrf.mxu1 }
 0x332   :  { %v451_v9 = vpop.f32.mrf.mxu0  ;;  %v533_v10 = vpop.f32.mrf.mxu1  ;;  %s811_s6 = spop %810 }
 0x333   :  { %s587_s7 = smul.f32 0.0054347827, %s811_s6 }
 0x334   :  { %v487_v11 = vpop.f32.mrf.mxu0  ;;  %s813_s30 = spop %812 }
 0x335   :  { %s602_s12 = smul.f32 %s587_s7, %s587_s7 }
 0x336   :  { %s601_s8 = smul.f32 0.0054347827, %s813_s30  ;;  %v489_v12 = vpop.f32.mrf.mxu0 }
 0x338   :  { %s603_s13 = ssub.f32 %s601_s8, %s602_s12  ;;  %v491_v13 = vpop.f32.mrf.mxu0 }
 0x33a   :  { %s604_s1 = smax.f32 %s948_s25, %s603_s13  ;;  %v492_v14 = vpop.f32.mrf.mxu0 }
 0x33b   :  { %s606_s2 = sadd.f32 1e-05, %s604_s1 }
 0x33c   :  { %v569_v15 = vpop.f32.mrf.mxu0 }
 0x33d   :  { %v607_v16 = vstv %s606_s2 }
 0x33e   :  { %853 = vrsqrt.f32 %v607_v16  ;;  %v796_v17 = vpop.f32.mrf.mxu0 }
 0x340   :  { %v572_v18 = vpop.f32.mrf.mxu0 }
 0x342   :  { %v797_v19 = vpop.f32.mrf.mxu0 }
 0x34b   :  { %v854_v20 = vpop.eup %853 }
 0x34c   :  { %814 = vpush %v854_v20 }
 0x37d   :  { %s815_s4 = spop %814 }
 0x37e   :  { %s610_s15 = smul.f32 %s815_s4, %s757_s14 }
 0x380   :  { %s612_s16 = smul.f32 %s610_s15, %s587_s7  ;;  %v614_v22 = vstv %s610_s15 }
 0x381   :  { %v615_v32 = vmul.f32 %v614_v22, %v446_v4  ;;  %v616_v33 = vmul.f32 %v614_v22, %v448_v5  ;;  %v617_v35 = vmul.f32 %v614_v22, %v487_v11  ;;  %v618_v36 = vmul.f32 %v614_v22, %v489_v12 }
 0x382   :  { %s613_s17 = ssub.f32 %s758_s3, %s612_s16  ;;  %v619_v37 = vmul.f32 %v614_v22, %v528_v3  ;;  %v620_v39 = vmul.f32 %v614_v22, %v530_v6  ;;  %v621_v45 = vmul.f32 %v614_v22, %v569_v15 }
 0x384   :  { %v623_v23 = vstv %s613_s17 }
 0x385   :  { %v624_v25 = vmul.f32 %v623_v23, %v622_v21 }
 0x387   :  { %v626_v34 = vadd.f32 %v625_v24, %v624_v25 }
 0x389   :  { %v631_v40 = vrot.slane %v626_v34, %v1063_v43  ;;  %v635_v41 = vrot.slane %v626_v34, %v634_v26  ;;  %v639_v42 = vrot.slane %v626_v34, %v638_v27  ;;  %v643_v44 = vrot.slane %v626_v34, %v642_v28 }
 0x38a   :  { %v647_v46 = vrot.slane %v626_v34, %v646_v29  ;;  %v651_v47 = vrot.slane %v626_v34, %v650_v30  ;;  %v655_v48 = vrot.slane %v626_v34, %v654_v31 }
 0x38b   :  { %v663_v49 = vadd.f32 %v631_v40, %v615_v32  ;;  %v664_v50 = vadd.f32 %v635_v41, %v616_v33  ;;  %v665_v51 = vadd.f32 %v639_v42, %v617_v35  ;;  %v666_v38 = vadd.f32 %v643_v44, %v618_v36 }
 0x38c   :  { %v667_v52 = vadd.f32 %v647_v46, %v619_v37  ;;  %v668_v53 = vadd.f32 %v651_v47, %v620_v39  ;;  %v669_v54 = vadd.f32 %v655_v48, %v621_v45 }
 0x38d   :  { %v670_v55 = vsub.f32 0.0, %v663_v49  ;;  %v671_v56 = vsub.f32 0.0, %v664_v50  ;;  %v672_v57 = vsub.f32 0.0, %v665_v51  ;;  %v673_v58 = vsub.f32 0.0, %v666_v38 }
 0x38e   :  { %v674_v59 = vsub.f32 0.0, %v667_v52  ;;  %v675_v43 = vsub.f32 0.0, %v668_v53  ;;  %v676_v60 = vsub.f32 0.0, %v669_v54 }
 0x38f   :  { %v677_v61 = vmul.f32 1.442695, %v670_v55  ;;  %v679_v62 = vmul.f32 1.442695, %v671_v56  ;;  %v681_v63 = vmul.f32 1.442695, %v672_v57 }
 0x390   :  { %v683_v0 = vmul.f32 1.442695, %v673_v58  ;;  %v685_v1 = vmul.f32 1.442695, %v674_v59  ;;  %v687_v2 = vmul.f32 1.442695, %v675_v43 }
 0x391   :  { %855 = vpow2.f32 %v677_v61  ;;  %v689_v4 = vmul.f32 1.442695, %v676_v60 }
 0x392   :  { %857 = vpow2.f32 %v679_v62 }
 0x393   :  { %859 = vpow2.f32 %v681_v63 }
 0x394   :  { %861 = vpow2.f32 %v683_v0 }
 0x395   :  { %863 = vpow2.f32 %v685_v1 }
 0x396   :  { %865 = vpow2.f32 %v687_v2 }
 0x397   :  { %867 = vpow2.f32 %v689_v4 }
 0x39e   :  { %v856_v3 = vpop.eup %855 }
 0x39f   :  { %v858_v5 = vpop.eup %857  ;;  %v691_v6 = vadd.f32 1.0, %v856_v3 }
 0x3a0   :  { %v860_v7 = vpop.eup %859  ;;  %v692_v8 = vadd.f32 1.0, %v858_v5 }
 0x3a1   :  { %v862_v9 = vpop.eup %861  ;;  %v693_v10 = vadd.f32 1.0, %v860_v7  ;;  %869 = vrcp.f32 %v691_v6 }
 0x3a2   :  { %v864_v11 = vpop.eup %863  ;;  %v694_v12 = vadd.f32 1.0, %v862_v9  ;;  %871 = vrcp.f32 %v692_v8 }
 0x3a3   :  { %v866_v13 = vpop.eup %865  ;;  %v695_v14 = vadd.f32 1.0, %v864_v11  ;;  %873 = vrcp.f32 %v693_v10 }
 0x3a4   :  { %v868_v15 = vpop.eup %867  ;;  %v696_v16 = vadd.f32 1.0, %v866_v13  ;;  %875 = vrcp.f32 %v694_v12 }
 0x3a5   :  { %v697_v17 = vadd.f32 1.0, %v868_v15  ;;  %877 = vrcp.f32 %v695_v14 }
 0x3a6   :  { %879 = vrcp.f32 %v696_v16 }
 0x3a7   :  { %881 = vrcp.f32 %v697_v17 }
 0x3ae   :  { %v870_v18 = vpop.eup %869 }
 0x3af   :  { %v872_v19 = vpop.eup %871  ;;  %705 = vst [vmem:[#allocation7] sm:$0xff] %v870_v18 }
 0x3b0   :  { %v874_v20 = vpop.eup %873  ;;  %706 = vst [vmem:[#allocation7 + $0x8] sm:$0xff] %v872_v19 }
 0x3b1   :  { %v876_v21 = vpop.eup %875  ;;  %707 = vst [vmem:[#allocation7 + $0x10] sm:$0xff] %v874_v20 }
 0x3b2   :  { %v878_v22 = vpop.eup %877  ;;  %708 = vst [vmem:[#allocation7 + $0x18] sm:$0xff] %v876_v21 }
 0x3b3   :  { %v880_v23 = vpop.eup %879  ;;  %709 = vst [vmem:[#allocation7 + $0x20] sm:$0xff] %v878_v22 }
 0x3b4   :  { %v882_v24 = vpop.eup %881  ;;  %710 = vst [vmem:[#allocation7 + $0x28] sm:$0xff] %v880_v23 }
 0x3b5   :  { %711 = vst [vmem:[#allocation7 + $0x30] sm:$0xff] %v882_v24 }
 0x3b6   :  { %926 = shalt.err (!%p923_p0)
}
 0x3b7   :  { %721 = dma.vmem_to_hbm [thread:$0]  %s719_s10, 896, %s1121_s11, [#allocation4]  }
 0x3b8   :  { %939 = dma.done.wait [#allocation4], 896  }
 0x3b9   :  { %940 = vsyncadd [#allocation4], 4294966400 }
 0x3ba   :  { %725 = vsyncpa [#allocation3], 1 }
 0x3bb   :  { %726 = vsyncpa [#allocation4], 1 }
 0x3bc   :  { %727 = vsyncpa [#allocation5], 1 }

</bundles_post_ra>
